<compile_context>
chip_gen: v6e
topology: v6e:2x2x1
jax: 0.10.0
libtpu: 0.0.40
codegen_flags: <defaults>
</compile_context>

<pallas_src>
import functools

import jax
import jax.numpy as jnp
import numpy as np
from jax.experimental import pallas as pl
from jax.experimental.pallas import tpu as pltpu

BN_EPS = 1e-5          # nn.BatchNorm2d default eps
LEAKY_SLOPE = 0.2      # nn.LeakyReLU(0.2)


def _conv_stats_kernel(oh, pw, cin, x_ref, w_ref, mask_ref, y_ref, stats_ref):
    """Pass 1 (per batch element): assemble patches in VMEM, y = W @ patches,
    store y and per-batch per-channel [sum, sum_sq] of the valid lanes.

    x_ref:     (4*Cin, Lpad)  bf16 phase-split flattened padded input
    w_ref:     (Cout, 16*Cin) bf16 spectral-normalized conv weight (resident)
    mask_ref:  (1, L)         f32 1.0 on real output columns, 0.0 on phantom
    y_ref:     (Cout, L)      f32 cached pre-BN activation (L = OH*PW lanes)
    stats_ref: (Cout, 2)      f32 per-batch [sum, sum_sq]
    """
    L = oh * pw
    parts = []
    for i in range(4):          # vertical tap
        a, r = i // 2, i % 2
        for j in range(4):      # horizontal tap
            b, c = j // 2, j % 2
            base = (r * 2 + c) * cin          # static sublane offset
            start = a * pw + b                # static lane offset
            parts.append(x_ref[base:base + cin, start:start + L])
    patch = jnp.concatenate(parts, axis=0)    # (16*Cin, L), k = (i*4+j)*Cin+ch

    y = jnp.dot(w_ref[...], patch, preferred_element_type=jnp.float32)
    y_ref[...] = y

    ym = y * mask_ref[...]                    # zero the phantom column
    stats_ref[:, 0:1] = jnp.sum(ym, axis=1, keepdims=True)
    stats_ref[:, 1:2] = jnp.sum(ym * ym, axis=1, keepdims=True)


def _bn_act_kernel(ow, y_ref, scale_ref, shift_ref, o_ref):
    """Pass 2 (per batch element): folded BN affine + LeakyReLU over cached y.

    y_ref:  (Cout, OH, PW) f32 ; the px = PW-1 column is phantom and dropped.
    o_ref:  (Cout, OH, OW) f32 — final NCHW activation tile.
    """
    y = y_ref[:, :, :ow]                                  # static slice
    out = y * scale_ref[...] + shift_ref[...]             # (Cout, OH, 1) bcast
    o_ref[...] = jnp.where(out >= 0.0, out, LEAKY_SLOPE * out)


@jax.jit
def downblock_forward(x, weight_sn, gamma, beta):
    """x: (N, Cin, H, W) NCHW, H/W even. weight_sn: (Cout, Cin, 4, 4)."""
    n, cin, h, w = x.shape
    assert h % 2 == 0 and w % 2 == 0, "stride-2 k=4 p=1 DownBlock expects even H/W"
    cout = weight_sn.shape[0]
    oh, ow = h // 2, w // 2
    ph, pw = oh + 1, ow + 1          # phase-grid spatial dims ((H+2)/2, (W+2)/2)
    L = oh * pw                      # lanes per image (incl. phantom column)
    lflat = ph * pw
    lpad = ((lflat + 1 + 127) // 128) * 128   # +1: tap (a=1,b=1) reads one past

    # --- zero-expansion relayout: pad + split rows/cols by parity + flatten.
    xp = jnp.pad(x, ((0, 0), (0, 0), (1, 1), (1, 1)))           # (N,Cin,H+2,W+2)
    xq = xp.reshape(n, cin, ph, 2, pw, 2).transpose(0, 3, 5, 1, 2, 4)
    xq = xq.reshape(n, 4 * cin, lflat)                          # row=(r*2+c)*Cin+ch
    xq = jnp.pad(xq, ((0, 0), (0, 0), (0, lpad - lflat))).astype(jnp.bfloat16)

    # weight flattened tap-major to match the kernel's patch-row order.
    w2 = weight_sn.transpose(0, 2, 3, 1).reshape(cout, 16 * cin).astype(jnp.bfloat16)

    # lane mask: 1.0 on real output columns, 0.0 on the phantom px = PW-1 column.
    col = jnp.arange(L, dtype=jnp.int32) % pw
    mask = (col < ow).astype(jnp.float32).reshape(1, L)

    # ---- pass 1: conv matmul, cache y, per-batch partial BN statistics.
    y_flat, stats = pl.pallas_call(
        functools.partial(_conv_stats_kernel, oh, pw, cin),
        out_shape=(jax.ShapeDtypeStruct((n, cout, L), jnp.float32),
                   jax.ShapeDtypeStruct((n, cout, 2), jnp.float32)),
        grid_spec=pltpu.PrefetchScalarGridSpec(
            num_scalar_prefetch=0,
            grid=(n,),
            in_specs=[pl.BlockSpec((None, 4 * cin, lpad), lambda i: (i, 0, 0)),
                      pl.BlockSpec((cout, 16 * cin), lambda i: (0, 0)),
                      pl.BlockSpec((1, L), lambda i: (0, 0))],
            out_specs=[pl.BlockSpec((None, cout, L), lambda i: (i, 0, 0)),
                       pl.BlockSpec((None, cout, 2), lambda i: (i, 0, 0))]),
        compiler_params=pltpu.CompilerParams(
            dimension_semantics=("parallel",)),
    )(xq, w2, mask)

    # Tiny per-channel math in plain JAX: reduce per-batch partials, form
    # train-mode (biased) batch statistics, fold with gamma/beta.
    # NOTE: E[y^2]-E[y]^2 in f32 — acceptable here; shifted sums would be the
    # robust alternative if |mean| >> std at very large N*OH*OW.
    count = jnp.float32(n * oh * ow)
    sums = jnp.sum(stats[:, :, 0], axis=0)
    sumsq = jnp.sum(stats[:, :, 1], axis=0)
    mean = sums / count
    var = jnp.maximum(sumsq / count - mean * mean, 0.0)
    scale = gamma.astype(jnp.float32) * jax.lax.rsqrt(var + BN_EPS)
    shift = beta.astype(jnp.float32) - mean * scale
    scale3 = jnp.broadcast_to(scale.reshape(cout, 1, 1), (cout, oh, 1))
    shift3 = jnp.broadcast_to(shift.reshape(cout, 1, 1), (cout, oh, 1))

    y4 = y_flat.reshape(n, cout, oh, pw)   # free split of the trailing dim

    # ---- pass 2: elementwise folded BN affine + LeakyReLU over cached y.
    out = pl.pallas_call(
        functools.partial(_bn_act_kernel, ow),
        out_shape=jax.ShapeDtypeStruct((n, cout, oh, ow), jnp.float32),
        grid_spec=pltpu.PrefetchScalarGridSpec(
            num_scalar_prefetch=0,
            grid=(n,),
            in_specs=[pl.BlockSpec((None, cout, oh, pw), lambda i: (i, 0, 0, 0)),
                      pl.BlockSpec((cout, oh, 1), lambda i: (0, 0, 0)),
                      pl.BlockSpec((cout, oh, 1), lambda i: (0, 0, 0))],
            out_specs=pl.BlockSpec((None, cout, oh, ow), lambda i: (i, 0, 0, 0))),
        compiler_params=pltpu.CompilerParams(
            dimension_semantics=("parallel",)),
    )(y4, scale3, shift3)

    return out


def _spectral_normalize(w, key, n_iters=20):
    """Divide conv weight by its largest singular value (power iteration on the
    (Cout, Cin*KH*KW) matrix), mirroring nn.utils.spectral_norm."""
    cout = w.shape[0]
    wm = w.reshape(cout, -1)
    u0 = jax.random.normal(key, (cout,), dtype=w.dtype)
    u0 = u0 / (jnp.linalg.norm(u0) + 1e-12)

    def body(_, u):
        v = wm.T @ u
        v = v / (jnp.linalg.norm(v) + 1e-12)
        u = wm @ v
        u = u / (jnp.linalg.norm(u) + 1e-12)
        return u

    u = jax.lax.fori_loop(0, n_iters, body, u0)
    v = wm.T @ u
    v = v / (jnp.linalg.norm(v) + 1e-12)
    sigma = u @ (wm @ v)
    return w / sigma


def _reference_forward(x, weight_sn, gamma, beta):
    """Pure-JAX f32 reference (lax conv + BN train-mode + LeakyReLU)."""
    y = jax.lax.conv_general_dilated(
        x, weight_sn, window_strides=(2, 2), padding=((1, 1), (1, 1)),
        dimension_numbers=("NCHW", "OIHW", "NCHW"))
    mean = jnp.mean(y, axis=(0, 2, 3), keepdims=True)
    var = jnp.mean((y - mean) ** 2, axis=(0, 2, 3), keepdims=True)
    y_hat = (y - mean) * jax.lax.rsqrt(var + BN_EPS)
    out = y_hat * gamma.reshape(1, -1, 1, 1) + beta.reshape(1, -1, 1, 1)
    return jnp.where(out >= 0.0, out, LEAKY_SLOPE * out)


if __name__ == "__main__":
    in_planes, out_planes = 4, 8
    N, H, W = 2, 16, 16

    key = jax.random.PRNGKey(0)
    k_x, k_w, k_u = jax.random.split(key, 3)

    x = jax.random.normal(k_x, (N, in_planes, H, W), dtype=jnp.float32)
    weight = jax.random.normal(k_w, (out_planes, in_planes, 4, 4), dtype=jnp.float32) * 0.1
    weight_sn = _spectral_normalize(weight, k_u)
    gamma = jnp.ones((out_planes,), dtype=jnp.float32)   # BatchNorm2d default init
    beta = jnp.zeros((out_planes,), dtype=jnp.float32)

    y = jax.block_until_ready(downblock_forward(x, weight_sn, gamma, beta))
    y_ref = jax.block_until_ready(_reference_forward(x, weight_sn, gamma, beta))

    assert y.shape == (N, out_planes, H // 2, W // 2), y.shape
    # bf16 MXU feed vs a full-f32 reference -> ~1e-2 level differences are
    # expected for the K=64 contraction; semantics are identical.
    np.testing.assert_allclose(np.asarray(y), np.asarray(y_ref), rtol=2e-2, atol=2e-2)

    print("KERNEL_OK")
</pallas_src>

<mosaic_0001>
module attributes {stable_mosaic.version = 11 : i64} {
  func.func @_conv_stats_kernel(%arg0: i32, %arg1: memref<1x16x128xbf16, #tpu.memory_space<vmem>>, %arg2: memref<8x64xbf16, #tpu.memory_space<vmem>>, %arg3: memref<1x72xf32, #tpu.memory_space<vmem>>, %arg4: memref<1x8x72xf32, #tpu.memory_space<vmem>>, %arg5: memref<1x8x2xf32, #tpu.memory_space<vmem>>) attributes {dimension_semantics = [#tpu.dimension_semantics<parallel>], iteration_bounds = array<i64: 2>, scalar_prefetch = 0 : i64, scratch_operands = 0 : i64, tpu.core_type = #tpu.core_type<tc>, window_params = [{transform_indices = @transform_0, window_bounds = array<i64: 1, 16, 128>}, {pipeline_mode = #tpu.pipeline_mode<synchronous>, transform_indices = @transform_1, window_bounds = array<i64: 8, 64>}, {pipeline_mode = #tpu.pipeline_mode<synchronous>, transform_indices = @transform_2, window_bounds = array<i64: 1, 72>}, {transform_indices = @transform_3, window_bounds = array<i64: 1, 8, 72>}, {transform_indices = @transform_4, window_bounds = array<i64: 1, 8, 2>}]} {
    %c0 = arith.constant 0 : index
    %c0_0 = arith.constant 0 : index
    %c0_1 = arith.constant 0 : index
    %0 = vector.load %arg1[%c0, %c0_0, %c0_1] : memref<1x16x128xbf16, #tpu.memory_space<vmem>>, vector<1x4x72xbf16>
    %1 = vector.shape_cast %0 : vector<1x4x72xbf16> to vector<4x72xbf16>
    %c0_2 = arith.constant 0 : index
    %c4 = arith.constant 4 : index
    %c0_3 = arith.constant 0 : index
    %2 = vector.load %arg1[%c0_2, %c4, %c0_3] : memref<1x16x128xbf16, #tpu.memory_space<vmem>>, vector<1x4x72xbf16>
    %3 = vector.shape_cast %2 : vector<1x4x72xbf16> to vector<4x72xbf16>
    %c0_4 = arith.constant 0 : index
    %c0_5 = arith.constant 0 : index
    %c1 = arith.constant 1 : index
    %4 = vector.load %arg1[%c0_4, %c0_5, %c1] : memref<1x16x128xbf16, #tpu.memory_space<vmem>>, vector<1x4x72xbf16>
    %5 = vector.shape_cast %4 : vector<1x4x72xbf16> to vector<4x72xbf16>
    %c0_6 = arith.constant 0 : index
    %c4_7 = arith.constant 4 : index
    %c1_8 = arith.constant 1 : index
    %6 = vector.load %arg1[%c0_6, %c4_7, %c1_8] : memref<1x16x128xbf16, #tpu.memory_space<vmem>>, vector<1x4x72xbf16>
    %7 = vector.shape_cast %6 : vector<1x4x72xbf16> to vector<4x72xbf16>
    %c0_9 = arith.constant 0 : index
    %c8 = arith.constant 8 : index
    %c0_10 = arith.constant 0 : index
    %8 = vector.load %arg1[%c0_9, %c8, %c0_10] : memref<1x16x128xbf16, #tpu.memory_space<vmem>>, vector<1x4x72xbf16>
    %9 = vector.shape_cast %8 : vector<1x4x72xbf16> to vector<4x72xbf16>
    %c0_11 = arith.constant 0 : index
    %c12 = arith.constant 12 : index
    %c0_12 = arith.constant 0 : index
    %10 = vector.load %arg1[%c0_11, %c12, %c0_12] : memref<1x16x128xbf16, #tpu.memory_space<vmem>>, vector<1x4x72xbf16>
    %11 = vector.shape_cast %10 : vector<1x4x72xbf16> to vector<4x72xbf16>
    %c0_13 = arith.constant 0 : index
    %c8_14 = arith.constant 8 : index
    %c1_15 = arith.constant 1 : index
    %12 = vector.load %arg1[%c0_13, %c8_14, %c1_15] : memref<1x16x128xbf16, #tpu.memory_space<vmem>>, vector<1x4x72xbf16>
    %13 = vector.shape_cast %12 : vector<1x4x72xbf16> to vector<4x72xbf16>
    %c0_16 = arith.constant 0 : index
    %c12_17 = arith.constant 12 : index
    %c1_18 = arith.constant 1 : index
    %14 = vector.load %arg1[%c0_16, %c12_17, %c1_18] : memref<1x16x128xbf16, #tpu.memory_space<vmem>>, vector<1x4x72xbf16>
    %15 = vector.shape_cast %14 : vector<1x4x72xbf16> to vector<4x72xbf16>
    %c0_19 = arith.constant 0 : index
    %c0_20 = arith.constant 0 : index
    %c9 = arith.constant 9 : index
    %16 = vector.load %arg1[%c0_19, %c0_20, %c9] : memref<1x16x128xbf16, #tpu.memory_space<vmem>>, vector<1x4x72xbf16>
    %17 = vector.shape_cast %16 : vector<1x4x72xbf16> to vector<4x72xbf16>
    %c0_21 = arith.constant 0 : index
    %c4_22 = arith.constant 4 : index
    %c9_23 = arith.constant 9 : index
    %18 = vector.load %arg1[%c0_21, %c4_22, %c9_23] : memref<1x16x128xbf16, #tpu.memory_space<vmem>>, vector<1x4x72xbf16>
    %19 = vector.shape_cast %18 : vector<1x4x72xbf16> to vector<4x72xbf16>
    %c0_24 = arith.constant 0 : index
    %c0_25 = arith.constant 0 : index
    %c10 = arith.constant 10 : index
    %20 = vector.load %arg1[%c0_24, %c0_25, %c10] : memref<1x16x128xbf16, #tpu.memory_space<vmem>>, vector<1x4x72xbf16>
    %21 = vector.shape_cast %20 : vector<1x4x72xbf16> to vector<4x72xbf16>
    %c0_26 = arith.constant 0 : index
    %c4_27 = arith.constant 4 : index
    %c10_28 = arith.constant 10 : index
    %22 = vector.load %arg1[%c0_26, %c4_27, %c10_28] : memref<1x16x128xbf16, #tpu.memory_space<vmem>>, vector<1x4x72xbf16>
    %23 = vector.shape_cast %22 : vector<1x4x72xbf16> to vector<4x72xbf16>
    %c0_29 = arith.constant 0 : index
    %c8_30 = arith.constant 8 : index
    %c9_31 = arith.constant 9 : index
    %24 = vector.load %arg1[%c0_29, %c8_30, %c9_31] : memref<1x16x128xbf16, #tpu.memory_space<vmem>>, vector<1x4x72xbf16>
    %25 = vector.shape_cast %24 : vector<1x4x72xbf16> to vector<4x72xbf16>
    %c0_32 = arith.constant 0 : index
    %c12_33 = arith.constant 12 : index
    %c9_34 = arith.constant 9 : index
    %26 = vector.load %arg1[%c0_32, %c12_33, %c9_34] : memref<1x16x128xbf16, #tpu.memory_space<vmem>>, vector<1x4x72xbf16>
    %27 = vector.shape_cast %26 : vector<1x4x72xbf16> to vector<4x72xbf16>
    %c0_35 = arith.constant 0 : index
    %c8_36 = arith.constant 8 : index
    %c10_37 = arith.constant 10 : index
    %28 = vector.load %arg1[%c0_35, %c8_36, %c10_37] : memref<1x16x128xbf16, #tpu.memory_space<vmem>>, vector<1x4x72xbf16>
    %29 = vector.shape_cast %28 : vector<1x4x72xbf16> to vector<4x72xbf16>
    %c0_38 = arith.constant 0 : index
    %c12_39 = arith.constant 12 : index
    %c10_40 = arith.constant 10 : index
    %30 = vector.load %arg1[%c0_38, %c12_39, %c10_40] : memref<1x16x128xbf16, #tpu.memory_space<vmem>>, vector<1x4x72xbf16>
    %31 = vector.shape_cast %30 : vector<1x4x72xbf16> to vector<4x72xbf16>
    %32 = tpu.concatenate %1, %3, %5, %7, %9, %11, %13, %15, %17, %19, %21, %23, %25, %27, %29, %31 in 0 : vector<4x72xbf16>, vector<4x72xbf16>, vector<4x72xbf16>, vector<4x72xbf16>, vector<4x72xbf16>, vector<4x72xbf16>, vector<4x72xbf16>, vector<4x72xbf16>, vector<4x72xbf16>, vector<4x72xbf16>, vector<4x72xbf16>, vector<4x72xbf16>, vector<4x72xbf16>, vector<4x72xbf16>, vector<4x72xbf16>, vector<4x72xbf16> -> vector<64x72xbf16>
    %c0_41 = arith.constant 0 : index
    %c0_42 = arith.constant 0 : index
    %33 = vector.load %arg2[%c0_41, %c0_42] : memref<8x64xbf16, #tpu.memory_space<vmem>>, vector<8x64xbf16>
    %cst = arith.constant dense<0.000000e+00> : vector<8x72xf32>
    %34 = tpu.matmul %33, %32, %cst {dimension_numbers = #tpu.dot_dimension_numbers<[1], [0], [0], [1], [0, 0, 1, 1], [], []>} : vector<8x64xbf16>, vector<64x72xbf16>, vector<8x72xf32> -> vector<8x72xf32>
    %c0_43 = arith.constant 0 : index
    %c0_44 = arith.constant 0 : index
    %c0_45 = arith.constant 0 : index
    %35 = vector.load %arg4[%c0_43, %c0_44, %c0_45] : memref<1x8x72xf32, #tpu.memory_space<vmem>>, vector<1x8x72xf32>
    %36 = vector.shape_cast %35 : vector<1x8x72xf32> to vector<8x72xf32>
    %37 = vector.shape_cast %34 : vector<8x72xf32> to vector<1x8x72xf32>
    tpu.vector_store %arg4[%c0_43, %c0_44, %c0_45], %37 {strides = array<i32>} : memref<1x8x72xf32, #tpu.memory_space<vmem>>, vector<1x8x72xf32>,
    %c0_46 = arith.constant 0 : index
    %c0_47 = arith.constant 0 : index
    %38 = vector.load %arg3[%c0_46, %c0_47] : memref<1x72xf32, #tpu.memory_space<vmem>>, vector<1x72xf32>
    %39 = vector.broadcast %38 : vector<1x72xf32> to vector<8x72xf32>
    %40 = arith.mulf %34, %39 : vector<8x72xf32>
    %cst_48 = arith.constant dense<0.000000e+00> : vector<8xf32>
    %41 = vector.multi_reduction <add>, %40, %cst_48 [1] : vector<8x72xf32> to vector<8xf32>
    %42 = vector.shape_cast %41 : vector<8xf32> to vector<8x1xf32>
    %c0_49 = arith.constant 0 : index
    %c0_50 = arith.constant 0 : index
    %c0_51 = arith.constant 0 : index
    %43 = vector.load %arg5[%c0_49, %c0_50, %c0_51] : memref<1x8x2xf32, #tpu.memory_space<vmem>>, vector<1x8x1xf32>
    %44 = vector.shape_cast %43 : vector<1x8x1xf32> to vector<8x1xf32>
    %45 = vector.shape_cast %42 : vector<8x1xf32> to vector<1x8x1xf32>
    tpu.vector_store %arg5[%c0_49, %c0_50, %c0_51], %45 {strides = array<i32>} : memref<1x8x2xf32, #tpu.memory_space<vmem>>, vector<1x8x1xf32>,
    %46 = arith.mulf %40, %40 : vector<8x72xf32>
    %cst_52 = arith.constant dense<0.000000e+00> : vector<8xf32>
    %47 = vector.multi_reduction <add>, %46, %cst_52 [1] : vector<8x72xf32> to vector<8xf32>
    %48 = vector.shape_cast %47 : vector<8xf32> to vector<8x1xf32>
    %c0_53 = arith.constant 0 : index
    %c0_54 = arith.constant 0 : index
    %c1_55 = arith.constant 1 : index
    %49 = vector.load %arg5[%c0_53, %c0_54, %c1_55] : memref<1x8x2xf32, #tpu.memory_space<vmem>>, vector<1x8x1xf32>
    %50 = vector.shape_cast %49 : vector<1x8x1xf32> to vector<8x1xf32>
    %51 = vector.shape_cast %48 : vector<8x1xf32> to vector<1x8x1xf32>
    tpu.vector_store %arg5[%c0_53, %c0_54, %c1_55], %51 {strides = array<i32>} : memref<1x8x2xf32, #tpu.memory_space<vmem>>, vector<1x8x1xf32>,
    return
  }
  func.func @transform_0(%arg0: i32) -> (i32, i32, i32) {
    %c0_i32 = arith.constant 0 : i32
    %c0_i32_0 = arith.constant 0 : i32
    %c0_i32_1 = arith.constant 0 : i32
    return %arg0, %c0_i32, %c0_i32_0 : i32, i32, i32
  }
  func.func @transform_1(%arg0: i32) -> (i32, i32) {
    %c0_i32 = arith.constant 0 : i32
    %c0_i32_0 = arith.constant 0 : i32
    %c0_i32_1 = arith.constant 0 : i32
    return %c0_i32, %c0_i32_0 : i32, i32
  }
  func.func @transform_2(%arg0: i32) -> (i32, i32) {
    %c0_i32 = arith.constant 0 : i32
    %c0_i32_0 = arith.constant 0 : i32
    %c0_i32_1 = arith.constant 0 : i32
    return %c0_i32, %c0_i32_0 : i32, i32
  }
  func.func @transform_3(%arg0: i32) -> (i32, i32, i32) {
    %c0_i32 = arith.constant 0 : i32
    %c0_i32_0 = arith.constant 0 : i32
    %c0_i32_1 = arith.constant 0 : i32
    return %arg0, %c0_i32, %c0_i32_0 : i32, i32, i32
  }
  func.func @transform_4(%arg0: i32) -> (i32, i32, i32) {
    %c0_i32 = arith.constant 0 : i32
    %c0_i32_0 = arith.constant 0 : i32
    %c0_i32_1 = arith.constant 0 : i32
    return %arg0, %c0_i32, %c0_i32_0 : i32, i32, i32
  }
}

module attributes {stable_mosaic.version = 11 : i64} {
  func.func @_bn_act_kernel(%arg0: i32, %arg1: memref<1x8x8x9xf32, #tpu.memory_space<vmem>>, %arg2: memref<8x8x1xf32, #tpu.memory_space<vmem>>, %arg3: memref<8x8x1xf32, #tpu.memory_space<vmem>>, %arg4: memref<1x8x8x8xf32, #tpu.memory_space<vmem>>) attributes {dimension_semantics = [#tpu.dimension_semantics<parallel>], iteration_bounds = array<i64: 2>, scalar_prefetch = 0 : i64, scratch_operands = 0 : i64, tpu.core_type = #tpu.core_type<tc>, window_params = [{transform_indices = @transform_0, window_bounds = array<i64: 1, 8, 8, 9>}, {pipeline_mode = #tpu.pipeline_mode<synchronous>, transform_indices = @transform_1, window_bounds = array<i64: 8, 8, 1>}, {pipeline_mode = #tpu.pipeline_mode<synchronous>, transform_indices = @transform_2, window_bounds = array<i64: 8, 8, 1>}, {transform_indices = @transform_3, window_bounds = array<i64: 1, 8, 8, 8>}]} {
    %c0 = arith.constant 0 : index
    %c0_0 = arith.constant 0 : index
    %c0_1 = arith.constant 0 : index
    %c0_2 = arith.constant 0 : index
    %0 = vector.load %arg1[%c0, %c0_0, %c0_1, %c0_2] : memref<1x8x8x9xf32, #tpu.memory_space<vmem>>, vector<1x8x8x8xf32>
    %1 = vector.shape_cast %0 : vector<1x8x8x8xf32> to vector<8x8x8xf32>
    %c0_3 = arith.constant 0 : index
    %c0_4 = arith.constant 0 : index
    %c0_5 = arith.constant 0 : index
    %2 = vector.load %arg2[%c0_3, %c0_4, %c0_5] : memref<8x8x1xf32, #tpu.memory_space<vmem>>, vector<8x8x1xf32>
    %3 = vector.broadcast %2 : vector<8x8x1xf32> to vector<8x8x8xf32>
    %4 = arith.mulf %1, %3 : vector<8x8x8xf32>
    %c0_6 = arith.constant 0 : index
    %c0_7 = arith.constant 0 : index
    %c0_8 = arith.constant 0 : index
    %5 = vector.load %arg3[%c0_6, %c0_7, %c0_8] : memref<8x8x1xf32, #tpu.memory_space<vmem>>, vector<8x8x1xf32>
    %6 = vector.broadcast %5 : vector<8x8x1xf32> to vector<8x8x8xf32>
    %7 = arith.addf %4, %6 : vector<8x8x8xf32>
    %cst = arith.constant 0.000000e+00 : f32
    %8 = vector.broadcast %cst : f32 to vector<8x8x8xf32>
    %9 = arith.cmpf oge, %7, %8 : vector<8x8x8xf32>
    %cst_9 = arith.constant 2.000000e-01 : f32
    %10 = vector.broadcast %cst_9 : f32 to vector<8x8x8xf32>
    %11 = arith.mulf %10, %7 : vector<8x8x8xf32>
    %12 = arith.select %9, %7, %11 : vector<8x8x8xi1>, vector<8x8x8xf32>
    %c0_10 = arith.constant 0 : index
    %c0_11 = arith.constant 0 : index
    %c0_12 = arith.constant 0 : index
    %c0_13 = arith.constant 0 : index
    %13 = vector.load %arg4[%c0_10, %c0_11, %c0_12, %c0_13] : memref<1x8x8x8xf32, #tpu.memory_space<vmem>>, vector<1x8x8x8xf32>
    %14 = vector.shape_cast %13 : vector<1x8x8x8xf32> to vector<8x8x8xf32>
    %15 = vector.shape_cast %12 : vector<8x8x8xf32> to vector<1x8x8x8xf32>
    tpu.vector_store %arg4[%c0_10, %c0_11, %c0_12, %c0_13], %15 {strides = array<i32>} : memref<1x8x8x8xf32, #tpu.memory_space<vmem>>, vector<1x8x8x8xf32>,
    return
  }
  func.func @transform_0(%arg0: i32) -> (i32, i32, i32, i32) {
    %c0_i32 = arith.constant 0 : i32
    %c0_i32_0 = arith.constant 0 : i32
    %c0_i32_1 = arith.constant 0 : i32
    %c0_i32_2 = arith.constant 0 : i32
    return %arg0, %c0_i32, %c0_i32_0, %c0_i32_1 : i32, i32, i32, i32
  }
  func.func @transform_1(%arg0: i32) -> (i32, i32, i32) {
    %c0_i32 = arith.constant 0 : i32
    %c0_i32_0 = arith.constant 0 : i32
    %c0_i32_1 = arith.constant 0 : i32
    %c0_i32_2 = arith.constant 0 : i32
    return %c0_i32, %c0_i32_0, %c0_i32_1 : i32, i32, i32
  }
  func.func @transform_2(%arg0: i32) -> (i32, i32, i32) {
    %c0_i32 = arith.constant 0 : i32
    %c0_i32_0 = arith.constant 0 : i32
    %c0_i32_1 = arith.constant 0 : i32
    %c0_i32_2 = arith.constant 0 : i32
    return %c0_i32, %c0_i32_0, %c0_i32_1 : i32, i32, i32
  }
  func.func @transform_3(%arg0: i32) -> (i32, i32, i32, i32) {
    %c0_i32 = arith.constant 0 : i32
    %c0_i32_0 = arith.constant 0 : i32
    %c0_i32_1 = arith.constant 0 : i32
    %c0_i32_2 = arith.constant 0 : i32
    return %arg0, %c0_i32, %c0_i32_0, %c0_i32_1 : i32, i32, i32, i32
  }
}

</mosaic_0001>

<bundles_post_ra>
// kernel: downblock_forward.2
= control target key start
LH: loop header
LB: loop body
LE: loop exit
PB: predicated region body
PF: predicated region fallthrough
CT: control target
= control target key end

     0   :  { %s523_s15 = smov 0   ;;  %s566_s0 = inlined_call_operand.vmem [shape: bf16[2,16,128], index: 0, kind: input, shape index: {}]   ;;  %s567_s1 = inlined_call_operand.vmem [shape: bf16[8,64], index: 1, kind: input, shape index: {}]   ;;  %s568_s2 = inlined_call_operand.vmem [shape: f32[1,72], index: 2, kind: input, shape index: {}]   ;;  %s569_s3 = inlined_call_operand.vmem [shape: f32[2,8,72], index: 3, kind: output, shape index: {0}]   ;;  %s570_s4 = inlined_call_operand.vmem [shape: f32[2,8,2], index: 4, kind: output, shape index: {1}]  }
   0x1 LB: > { %s433_s16 = sadd.s32 4294967295, %s491_s15   ;;  %p437_p0 = scmp.ge.s32.totalorder %s491_s15, 1  ;;  %s491_s15 = sphi %s523_s15, %s15_s15  }
   0x2   : > { %p165_p1 = scmp.lt.s32.totalorder %s491_s15, 3 }
   0x4   : > { %p166_p2 = pnand %p437_p0, %p165_p1 }
   0x5   : > { %p194_p3 = scmp.lt.s32.totalorder (!%p166_p2), %s433_s16, 1  ;;  %s494_s21 = smov (!%p166_p2), 118  }
   0x6   : > { %169 = sbr.rel (%p166_p2) target bundleno = 494 (0x1ee), region = 32  ;;  %s495_s22 = smov (!%p166_p2), 119  }
   0x7   : > { %s497_s23 = smov (!%p166_p2), 127  }
   0xb   : > { %v493_v0 = vmov 0.0   ;;  %s572_s16 = smov (!%p194_p3, %s433_s16), 1  ;;  %vm248_vm0 = vcmask 1041408   ;;  %vm496_vm1 = vmmov 0   ;;  %vm252_vm2 = vcmask 1043456  }
   0xc   : > { %456 = vmatprep.subr.bf16.mxu0 %v493_v0  ;;  %s531_s17 = sshll.u32 %s572_s16, 3  ;;  %464 = vmatprep.mubr.msk.bf16.mxu0 %vm496_vm1, %v493_v0  ;;  %vm255_vm3 = vcmask 1045504   ;;  %v283_v33 = vld [vmem:[%s567_s1] sm:$0xf]  ;;  %vm284_vm4 = vcmask 523264   ;;  %vm328_vm5 = vcmask 588800  }
   0xd   : > { %s198_s20 = scalar_lea.vmem %s566_s0, %s531_s17  ;;  %s202_s28 = scalar_lea.vmem %s569_s3, %s531_s17  ;;  %v447_v34 = vld [vmem:[%s568_s2] ss:$0 sm:$0xff]  ;;  %vm341_vm6 = vcmask 7168   ;;  %vm347_vm7 = vcmask 15368  }
   0xe   : > { %v210_v1 = vld [vmem:[%s198_s20 + $0x4] sm:$0x3]  ;;  %v211_v2 = vld [vmem:[%s198_s20 + $0x4] sm:$0xc]  ;;  %v209_v5 = vld [vmem:[%s198_s20] sm:$0xc]  ;;  %s206_s7 = scalar_lea.vmem %s570_s4, %s531_s17 }
   0xf   : > { %v444_v3 = vcombine.low %v210_v1, %v210_v1  ;;  %v445_v4 = vcombine.low %v211_v2, %v211_v2  ;;  %v208_v6 = vld [vmem:[%s198_s20] sm:$0x3]  ;;  %v261_v7 = vsel %vm248_vm0, %v210_v1, %v211_v2  ;;  %v443_v8 = vcombine.low %v209_v5, %v209_v5 }
  0x10   : > { %v442_v9 = vcombine.low %v208_v6, %v208_v6  ;;  %v251_v10 = vsel %vm248_vm0, %v208_v6, %v209_v5 }
  0x11   : > { %244 = vrot.lane.b32.xlu1 %v444_v3, %s494_s21  ;;  %240 = vrot.lane.b32.xlu0 %v444_v3, %s495_s22 }
  0x15   : > { %246 = vrot.lane.b32.xlu1 %v445_v4, %s494_s21  ;;  %242 = vrot.lane.b32.xlu0 %v445_v4, %s495_s22 }
  0x19   : > { %234 = vrot.lane.b32.xlu1 %v443_v8, %s495_s22  ;;  %232 = vrot.lane.b32.xlu0 %v442_v9, %s495_s22 }
  0x1d   : > { %236 = vrot.lane.b32.xlu0 %v442_v9, %s494_s21  ;;  %238 = vrot.lane.b32.xlu1 %v443_v8, %s494_s21 }
  0x21   : > { %225 = vrot.lane.b32.xlu0 %v444_v3, %s497_s23  ;;  %230 = vrot.lane.b32.xlu1 %v445_v4, %s497_s23 }
  0x25   : > { %215 = vrot.lane.b32.xlu0 %v442_v9, %s497_s23  ;;  %220 = vrot.lane.b32.xlu1 %v443_v8, %s497_s23 }
  0x83   : > { %v245_v11 = vpop.permute.xlu1 %244  ;;  %v241_v12 = vpop.permute.xlu0 %240 }
  0x87   : > { %v247_v13 = vpop.permute.xlu1 %246  ;;  %v243_v14 = vpop.permute.xlu0 %242 }
  0x88   : > { %v277_v15 = vsel %vm248_vm0, %v241_v12, %v243_v14 }
  0x89   : > { %v279_v16 = vsel %vm252_vm2, %v277_v15, %v245_v11 }
  0x8a   : > { %v281_v17 = vsel %vm255_vm3, %v279_v16, %v247_v13 }
  0x8b   : > { %457 = vmatpush3.bf16.msra.mxu0 %v281_v17  ;;  %v235_v18 = vpop.permute.xlu1 %234  ;;  %v233_v19 = vpop.permute.xlu0 %232 }
  0x8c   : > { %458 = vmatprep.subr.bf16.mxu0 %v493_v0  ;;  %v269_v20 = vsel %vm248_vm0, %v233_v19, %v235_v18 }
  0x8f   : > { %v237_v21 = vpop.permute.xlu0 %236  ;;  %v239_v22 = vpop.permute.xlu1 %238 }
  0x90   : > { %v271_v23 = vsel %vm252_vm2, %v269_v20, %v237_v21 }
  0x91   : > { %v273_v24 = vsel %vm255_vm3, %v271_v23, %v239_v22 }
  0x92   : > { %459 = vmatpush3.bf16.msra.mxu0 %v273_v24 }
  0x93   : > { %v226_v25 = vpop.permute.xlu0 %225  ;;  %v231_v26 = vpop.permute.xlu1 %230  ;;  %460 = vmatprep.subr.bf16.mxu0 %v493_v0 }
  0x94   : > { %v263_v27 = vsel %vm252_vm2, %v261_v7, %v226_v25 }
  0x95   : > { %v265_v28 = vsel %vm255_vm3, %v263_v27, %v231_v26 }
  0x96   : > { %461 = vmatpush3.bf16.msra.mxu0 %v265_v28 }
  0x97   : > { %v216_v29 = vpop.permute.xlu0 %215  ;;  %v221_v30 = vpop.permute.xlu1 %220  ;;  %462 = vmatprep.subr.bf16.mxu0 %v493_v0 }
  0x98   : > { %v254_v31 = vsel %vm252_vm2, %v251_v10, %v216_v29 }
  0x99   : > { %v257_v32 = vsel %vm255_vm3, %v254_v31, %v221_v30 }
  0x9a   : > { %463 = vmatpush3.bf16.msra.mxu0 %v257_v32 }
  0x9d   : > { %465 = vmatmul.mubr.msk.bf16.vlgmr.msra.gmra.mxu0 %vm284_vm4, %v283_v33 }
 0x15d   : > { %v322_v35 = vpop.f32.mrf.mxu0 }
 0x15e   : > { %329 = vst.msk [vmem:[%s202_s28] sm:$0xff] %vm328_vm5, %v322_v35  ;;  %v337_v36 = vmul.f32 %v447_v34, %v322_v35 }
 0x15f   : > { %v466_v37 = vpop.f32.mrf.mxu0 }
 0x160   : > { %v338_v38 = vsel %vm328_vm5, %v337_v36, 0.0  ;;  %v343_v39 = vmul.f32 %v337_v36, %v337_v36 }
 0x161   : > { %339 = vadd.xlane.f32.xlu0 %v338_v38  ;;  %v325_v40 = vpop.f32.mrf.mxu0 }
 0x162   : > { %v344_v41 = vsel %vm328_vm5, %v343_v39, 0.0 }
 0x163   : > { %345 = vadd.xlane.f32.xlu1 %v344_v41  ;;  %v467_v42 = vpop.f32.mrf.mxu0 }
 0x1ea   : > { %v340_v43 = vpop.xlane.xlu0 %339 }
 0x1eb   : > { %342 = vst.msk [vmem:[%s206_s7] sm:$0xff] %vm341_vm6, %v340_v43 }
 0x1ec   : > { %v346_v44 = vpop.xlane.xlu1 %345 }
 0x1ed   : > { %348 = vst.msk [vmem:[%s206_s7] sm:$0xff] %vm347_vm7, %v346_v44 }
 0x1ee PF: > { %s15_s15 = sadd.s32 1, %s491_s15  }
 0x1ef   : > { %p12_p4 = scmp.ge.s32.totalorder %s15_s15, 4  }
 0x1f1   :  { %14 = sbr.rel (!%p12_p4) target bundleno = 1 (0x1), region = 74 }

// kernel: downblock_forward.3
= control target key start
LH: loop header
LB: loop body
LE: loop exit
PB: predicated region body
PF: predicated region fallthrough
CT: control target
= control target key end

     0   :  { %8 = vsyncpa [#allocation3], 0  ;;  %s725_s0 = inlined_call_operand.vmem [shape: f32[2,8,8,9], index: 0, kind: input, shape index: {}]   ;;  %s726_s1 = inlined_call_operand.vmem [shape: f32[8,8,1], index: 1, kind: input, shape index: {}]   ;;  %s727_s2 = inlined_call_operand.vmem [shape: f32[8,8,1], index: 2, kind: input, shape index: {}]   ;;  %s728_s3 = inlined_call_operand.hbm [shape: f32[2,8,8,8], index: 3, kind: output, shape index: {}]  }
   0x1   :  { %10 = vsyncpa [#allocation3 + $0x1], 0  ;;  %s542_s12 = smov 0   ;;  %s544_s13 = smov 0  }
   0x2   :  { %s546_s14 = smov 0   ;;  %s548_s15 = smov 0  }
   0x3 LB: > { %s563_s16 = sadd.s32 4294967295, %s516_s15   ;;  %s398_s17 = sadd.s32 4294967294, %s516_s15   ;;  %s516_s15 = sphi %s548_s15, %s734_s15   ;;  %s512_s14 = sphi %s546_s14, %s733_s14   ;;  %s508_s13 = sphi %s544_s13, %s732_s13   ;;  %s504_s12 = sphi %s542_s12, %s731_s12  }
   0x4   : > { %s567_s18 = sadd.s32 1, %s516_s15   ;;  %s91_s19 = sadd.s32 1, %s512_s14 }
   0x5   : > { %s88_s20 = ssub.s32 %s516_s15, %s567_s18  ;;  %p101_p0 = scmp.ne.s32.totalorder %s512_s14, %s508_s13 }
   0x6   : > { %p89_p1 = scmp.eq.s32.totalorder %s88_s20, 0  ;;  %p102_p2 = scmp.eq.s32.totalorder %s563_s16, 1 }
   0x7   : > { %p107_p3 = scmp.ne.s32.totalorder %s508_s13, %s504_s12  ;;  %p108_p4 = scmp.eq.s32.totalorder %s398_s17, 1 }
   0x8   : > { %s578_s21 = scalar_select %p89_p1, %s512_s14, %s91_s19  }
   0x9   : > { %p580_p5 = por %p102_p2, %p101_p0  ;;  %p584_p6 = por %p108_p4, %p107_p3 }
   0xa   : > { %p401_p7 = scmp.ge.s32.totalorder %s516_s15, 1  ;;  %p140_p8 = scmp.lt.s32.totalorder %s516_s15, 3 }
   0xc   : > { %p141_p9 = pnand %p401_p7, %p140_p8 }
   0xd   : > { %p164_p10 = scmp.lt.s32.totalorder (!%p141_p9), %s563_s16, 1  ;;  %s161_s25 = sand.u32 (!%p141_p9), 1, %s508_s13  }
   0xe   : > { %144 = sbr.rel (%p141_p9) target bundleno = 192 (0xc0), region = 32  ;;  %s402_s26 = sshll.u32 (!%p141_p9), %s161_s25, 6 }
   0xf   : > { %s656_s27 = scalar_lea.vmem (!%p141_p9), [#allocation2], %s402_s26  ;;  %s411_s28 = sshll.u32 (!%p141_p9), %s563_s16, 10 }
  0x10   : > { %s336_s29 = sshll.u32 (!%p141_p9), %s656_s27, 4  ;;  %s685_s5 = scalar_lea.sflag (!%p141_p9), [#allocation3], %s161_s25  ;;  %s677_s29 = int_to_ptr.vmem [resolvable:$true] %s336_s29 }
  0x11   : > { %s456_s6 = scalar_lea.vmem (!%p141_p9), %s677_s29, 1024  ;;  %s519_s7 = smov (!%p141_p9), [#allocation2]  }
  0x12   : > { %p457_p11 = scmp.ne.s32.totalorder (!%p141_p9), %s677_s29, %s456_s6  ;;  %s460_s8 = sshll.u32 (!%p141_p9), %s519_s7, 4  ;;  %s461_s8 = int_to_ptr.vmem [resolvable:$false] %s460_s8 }
  0x13   : > { %v179_v0 = vld [vmem:[%s726_s1 + $0x10] sm:$0xff]  ;;  %v177_v1 = vld [vmem:[%s726_s1] sm:$0xff]  ;;  %v518_v2 = vmov 0   ;;  %v180_v3 = vld [vmem:[%s726_s1 + $0x18] sm:$0xff]  ;;  %s165_s11 = scalar_select %p164_p10, %s563_s16, 1  ;;  %vm313_vm0 = vcmask 64512  }
  0x14   : > { %455 = vset.pattern.permute.xlu1 %v518_v2  ;;  %454 = vset.pattern.permute.xlu0 %v518_v2  ;;  %v178_v4 = vld [vmem:[%s726_s1 + $0x8] sm:$0xff]  ;;  %v181_v6 = vld [vmem:[%s726_s1 + $0x20] sm:$0xff]  ;;  %v184_v7 = vld [vmem:[%s726_s1 + $0x38] sm:$0xff]  ;;  %s675_s16 = scalar_lea.hbm %s728_s3, %s411_s28  ;;  %p458_p12 = pnand %p457_p11, %p580_p5 }
  0x15   : > { %197 = vperm.xlu1 %455, %v179_v0   ;;  %187 = vperm.xlu0 %454, %v177_v1   ;;  %v182_v5 = vld [vmem:[%s726_s1 + $0x28] sm:$0xff]  ;;  %v183_v8 = vld [vmem:[%s726_s1 + $0x30] sm:$0xff]  ;;  %v233_v10 = vld [vmem:[%s727_s2] sm:$0xff]  ;;  %s410_s17 = sshll.u32 %s165_s11, 6  ;;  %s462_s9 = scalar_lea.vmem %s461_s8, 2048 }
  0x16   : > { %v234_v9 = vld [vmem:[%s727_s2 + $0x8] sm:$0xff]  ;;  %v236_v11 = vld [vmem:[%s727_s2 + $0x18] sm:$0xff]  ;;  %v235_v12 = vld [vmem:[%s727_s2 + $0x10] sm:$0xff]  ;;  %s643_s24 = scalar_lea.vmem %s725_s0, %s410_s17  ;;  %p459_p13 = pneg %p458_p12 }
  0x17   : > { %v238_v13 = vld [vmem:[%s727_s2 + $0x28] sm:$0xff]  ;;  %v237_v14 = vld [vmem:[%s727_s2 + $0x20] sm:$0xff]  ;;  %v240_v15 = vld [vmem:[%s727_s2 + $0x38] sm:$0xff]  ;;  %p463_p0 = scmp.lt.s32.totalorder %s677_s29, %s461_s8  ;;  %p464_p1 = scmp.lt.s32.totalorder %s462_s9, %s456_s6 }
  0x18   : > { %v239_v16 = vld [vmem:[%s727_s2 + $0x30] sm:$0xff]  ;;  %v169_v23 = vld [vmem:[%s643_s24] sm:$0xff]  ;;  %v170_v24 = vld [vmem:[%s643_s24 + $0x8] sm:$0xff] }
  0x19   : > { %202 = vperm.xlu1 %455, %v180_v3   ;;  %192 = vperm.xlu0 %454, %v178_v4   ;;  %v171_v27 = vld [vmem:[%s643_s24 + $0x10] sm:$0xff]  ;;  %v172_v29 = vld [vmem:[%s643_s24 + $0x18] sm:$0xff]  ;;  %v174_v37 = vld [vmem:[%s643_s24 + $0x28] sm:$0xff]  ;;  %p465_p2 = por %p464_p1, %p463_p0 }
  0x1a   : > { %v173_v38 = vld [vmem:[%s643_s24 + $0x20] sm:$0xff]  ;;  %v176_v49 = vld [vmem:[%s643_s24 + $0x38] sm:$0xff]  ;;  %v175_v50 = vld [vmem:[%s643_s24 + $0x30] sm:$0xff] }
  0x1b   : > { %p466_p3 = pnand %p465_p2, %p459_p13 }
  0x1d   : > { %212 = vperm.xlu1 %455, %v182_v5   ;;  %207 = vperm.xlu0 %454, %v181_v6  }
  0x21   : > { %222 = vperm.xlu1 %455, %v184_v7   ;;  %217 = vperm.xlu0 %454, %v183_v8  }
  0x25   : > { %248 = vperm.xlu1 %455, %v234_v9   ;;  %243 = vperm.xlu0 %454, %v233_v10  }
  0x29   : > { %258 = vperm.xlu1 %455, %v236_v11   ;;  %253 = vperm.xlu0 %454, %v235_v12  }
  0x2d   : > { %268 = vperm.xlu1 %455, %v238_v13   ;;  %263 = vperm.xlu0 %454, %v237_v14  }
  0x31   : > { %278 = vperm.xlu1 %455, %v240_v15   ;;  %273 = vperm.xlu0 %454, %v239_v16  }
  0x90   : > { %v198_v17 = vpop.permute.xlu1 %197  ;;  %v188_v18 = vpop.permute.xlu0 %187 }
  0x91   : > { %v225_v28 = vmul.f32 %v188_v18, %v169_v23  ;;  %v227_v35 = vmul.f32 %v198_v17, %v171_v27 }
  0x94   : > { %v203_v19 = vpop.permute.xlu1 %202  ;;  %v193_v20 = vpop.permute.xlu0 %192 }
  0x95   : > { %v226_v30 = vmul.f32 %v193_v20, %v170_v24  ;;  %v228_v36 = vmul.f32 %v203_v19, %v172_v29 }
  0x98   : > { %v213_v21 = vpop.permute.xlu1 %212  ;;  %v208_v22 = vpop.permute.xlu0 %207 }
  0x99   : > { %v230_v47 = vmul.f32 %v213_v21, %v174_v37  ;;  %v229_v48 = vmul.f32 %v208_v22, %v173_v38 }
  0x9c   : > { %v223_v25 = vpop.permute.xlu1 %222  ;;  %v218_v26 = vpop.permute.xlu0 %217 }
  0x9d   : > { %v232_v59 = vmul.f32 %v223_v25, %v176_v49  ;;  %v231_v60 = vmul.f32 %v218_v26, %v175_v50 }
  0xa0   : > { %v249_v31 = vpop.permute.xlu1 %248  ;;  %v244_v32 = vpop.permute.xlu0 %243 }
  0xa1   : > { %v282_v33 = vadd.f32 %v249_v31, %v226_v30  ;;  %v281_v34 = vadd.f32 %v244_v32, %v225_v28 }
  0xa3   : > { %vm290_vm1 = vcmp.ge.f32.partialorder %v282_v33, 0.0  ;;  %v298_v39 = vmul.f32 0.2, %v282_v33  ;;  %vm289_vm2 = vcmp.ge.f32.partialorder %v281_v34, 0.0  ;;  %v297_v40 = vmul.f32 0.2, %v281_v34 }
  0xa4   : > { %v259_v41 = vpop.permute.xlu1 %258  ;;  %v254_v42 = vpop.permute.xlu0 %253 }
  0xa5   : > { %v306_v43 = vsel %vm290_vm1, %v282_v33, %v298_v39  ;;  %v305_v44 = vsel %vm289_vm2, %v281_v34, %v297_v40  ;;  %v284_v45 = vadd.f32 %v259_v41, %v228_v36  ;;  %v283_v46 = vadd.f32 %v254_v42, %v227_v35 }
  0xa6   : > { %315 = vst.msk [vmem:[%s656_s27 + $0x8] sm:$0xff] %vm313_vm0, %v306_v43  ;;  %314 = vst.msk [vmem:[%s656_s27] sm:$0xff] %vm313_vm0, %v305_v44 }
  0xa7   : > { %vm292_vm3 = vcmp.ge.f32.partialorder %v284_v45, 0.0  ;;  %v300_v51 = vmul.f32 0.2, %v284_v45  ;;  %vm291_vm4 = vcmp.ge.f32.partialorder %v283_v46, 0.0  ;;  %v299_v52 = vmul.f32 0.2, %v283_v46 }
  0xa8   : > { %v269_v53 = vpop.permute.xlu1 %268  ;;  %v264_v54 = vpop.permute.xlu0 %263 }
  0xa9   : > { %v308_v55 = vsel %vm292_vm3, %v284_v45, %v300_v51  ;;  %v307_v56 = vsel %vm291_vm4, %v283_v46, %v299_v52  ;;  %v286_v57 = vadd.f32 %v269_v53, %v230_v47  ;;  %v285_v58 = vadd.f32 %v264_v54, %v229_v48 }
  0xaa   : > { %317 = vst.msk [vmem:[%s656_s27 + $0x18] sm:$0xff] %vm313_vm0, %v308_v55  ;;  %316 = vst.msk [vmem:[%s656_s27 + $0x10] sm:$0xff] %vm313_vm0, %v307_v56 }
  0xab   : > { %vm294_vm5 = vcmp.ge.f32.partialorder %v286_v57, 0.0  ;;  %v302_v61 = vmul.f32 0.2, %v286_v57  ;;  %vm293_vm6 = vcmp.ge.f32.partialorder %v285_v58, 0.0  ;;  %v301_v62 = vmul.f32 0.2, %v285_v58 }
  0xac   : > { %v279_v63 = vpop.permute.xlu1 %278  ;;  %v274_v0 = vpop.permute.xlu0 %273 }
  0xad   : > { %v310_v1 = vsel %vm294_vm5, %v286_v57, %v302_v61  ;;  %v309_v2 = vsel %vm293_vm6, %v285_v58, %v301_v62  ;;  %v288_v3 = vadd.f32 %v279_v63, %v232_v59  ;;  %v287_v4 = vadd.f32 %v274_v0, %v231_v60 }
  0xae   : > { %319 = vst.msk [vmem:[%s656_s27 + $0x28] sm:$0xff] %vm313_vm0, %v310_v1  ;;  %318 = vst.msk [vmem:[%s656_s27 + $0x20] sm:$0xff] %vm313_vm0, %v309_v2 }
  0xaf   : > { %vm296_vm7 = vcmp.ge.f32.partialorder %v288_v3, 0.0  ;;  %v304_v5 = vmul.f32 0.2, %v288_v3  ;;  %vm295_vm8 = vcmp.ge.f32.partialorder %v287_v4, 0.0  ;;  %v303_v6 = vmul.f32 0.2, %v287_v4 }
  0xb1   : > { %v312_v7 = vsel %vm296_vm7, %v288_v3, %v304_v5  ;;  %v311_v8 = vsel %vm295_vm8, %v287_v4, %v303_v6 }
  0xb2   : > { %321 = vst.msk [vmem:[%s656_s27 + $0x38] sm:$0xff] %vm313_vm0, %v312_v7  ;;  %320 = vst.msk [vmem:[%s656_s27 + $0x30] sm:$0xff] %vm313_vm0, %v311_v8 }
  0xb3   : > { %469 = shalt.err (!%p466_p3)
}
  0xb4   : > { %s470_s10 = scalar_lea.hbm %s675_s16, 1024  ;;  %s474_s19 = scalar_lea.hbm %s728_s3, 2048 }
  0xb5   : > { %p471_p4 = scmp.ne.s32.totalorder %s675_s16, %s470_s10  ;;  %p475_p9 = scmp.lt.s32.totalorder %s675_s16, %s728_s3 }
  0xb6   : > { %p476_p10 = scmp.lt.s32.totalorder %s474_s19, %s470_s10 }
  0xb7   : > { %p472_p7 = pnand %p471_p4, %p580_p5 }
  0xb8   : > { %p477_p11 = por %p476_p10, %p475_p9 }
  0xb9   : > { %p473_p8 = pneg %p472_p7 }
  0xbb   : > { %p478_p12 = pnand %p477_p11, %p473_p8 }
  0xbd   : > { %481 = shalt.err (!%p478_p12)
}
  0xbe   : > { %s520_s25 = smov 128   ;;  %s521_s26 = smov 8  }
  0xbf   : > { %412 = dma.vmem_to_hbm [thread:$0]  (%p580_p5), %s677_s29, 1024, %s675_s16, %s685_s5, %s520_s25, %s520_s25, %s521_s26  }
  0xc0 PF: > { %p418_p13 = scmp.ge.s32.totalorder %s516_s15, 2  ;;  %s351_s27 = sand.u32 1, %s504_s12  }
  0xc1   : > { %s352_s28 = scalar_lea.sflag [#allocation3], %s351_s27 }
  0xc2   : > { %p415_p0 = pnand %p418_p13, %p584_p6 }
  0xc4   : > { %p416_p1 = pneg %p415_p0 }
  0xc6   : > { %499 = dma.done.wait (%p416_p1), %s352_s28, 1024  }
  0xc7   : > { %501 = vsyncadd (%p416_p1), %s352_s28, 4294966272  ;;  %p13_p2 = scmp.ge.s32.totalorder %s567_s18, 4   ;;  %s731_s12 = smov %s508_s13 }
  0xc8   : > { %s732_s13 = smov %s512_s14  ;;  %s733_s14 = smov %s578_s21 }
  0xc9   : > { %s734_s15 = smov %s567_s18  ;;  %15 = sbr.rel (!%p13_p2) target bundleno = 3 (0x3), region = 67 }
  0xce   :  { %357 = vsyncpa [#allocation3], 1 }
  0xcf   :  { %359 = vsyncpa [#allocation3 + $0x1], 1 }

</bundles_post_ra>
